<compile_context>
chip_gen: v6e
topology: v6e:2x2x1
jax: 0.10.0
libtpu: 0.0.40
codegen_flags: <defaults>
</compile_context>

<pallas_src>
import functools

import jax
import jax.numpy as jnp
from jax.experimental import pallas as pl
from jax.experimental.pallas import tpu as pltpu


def aspect_sentiment_kernel(blk_rng_ref, start_ref, end_ref, hid_ref,
                            pooled_ref, wp_ref, wa_ref, b_ref,
                            out_ref, acc_ref, *, seq_len):
    """Grid = (B // TB, S // TS); batch axis "parallel", seq axis "arbitrary".

    blk_rng_ref: SMEM (B//TB, 2) int32  [first, last] seq-block of the span union
    start_ref/end_ref: VMEM (TB, 1) int32   aspect span [start, end) per example
    hid_ref:           VMEM (TB, TS, H)     bert last_hidden_state tile (bf16/f32)
    pooled_ref:        VMEM (TB, H)  f32    bert pooled_output
    wp_ref:            VMEM (C, H)   f32    linear weight half for pooled features
    wa_ref:            VMEM (C, H)   f32    linear weight half for aspect features
    b_ref:             VMEM (1, C)   f32    linear bias
    out_ref:           VMEM (TB, C)  f32    sentiment logits
    acc_ref:           VMEM (TB, H)  f32    scratch: running masked sum
    """
    b = pl.program_id(0)
    s = pl.program_id(1)
    ns = pl.num_programs(1)
    TB, TS, H = hid_ref.shape

    @pl.when(s == 0)
    def _init():
        acc_ref[...] = jnp.zeros_like(acc_ref)

    # Only sequence blocks inside this batch tile's span union contribute;
    # the hidden BlockSpec index_map is clamped to the same range so the
    # skipped iterations also issue no new DMA.
    in_range = jnp.logical_and(s >= blk_rng_ref[b, 0], s <= blk_rng_ref[b, 1])

    @pl.when(in_range)
    def _accumulate():
        st = jnp.clip(start_ref[...], 0, seq_len).reshape(TB, 1, 1)
        en = jnp.clip(end_ref[...], 0, seq_len).reshape(TB, 1, 1)
        # Global sequence positions of this tile, built directly in the
        # (TB, 1, TS) layout (TS on the lane axis, no relayout).
        seq = jax.lax.broadcasted_iota(jnp.int32, (TB, 1, TS), 2) + s * TS
        # Strict 0/1 mask in the stream dtype (exact in bf16).
        mask01 = jnp.logical_and(seq >= st, seq < en).astype(hid_ref.dtype)
        # Batched MXU contraction over TS: (TB,1,TS) x (TB,TS,H) -> (TB,1,H),
        # f32 accumulation.
        part = jax.lax.dot_general(
            mask01, hid_ref[...],
            dimension_numbers=(((2,), (1,)), ((0,), (0,))),
            preferred_element_type=jnp.float32)
        acc_ref[...] += part.reshape(TB, H)

    # ---- epilogue: cat([pooled, aspect]) @ W.T + b ---------------------------
    # realized as pooled @ Wp.T + aspect @ Wa.T + b with the weight halves kept
    # in (C, H) layout (contract on H, the lane axis).
    @pl.when(s == ns - 1)
    def _finalize():
        st = jnp.clip(start_ref[...], 0, seq_len)                       # (TB,1)
        en = jnp.clip(end_ref[...], 0, seq_len)                         # (TB,1)
        inv_cnt = 1.0 / jnp.maximum(en - st, 1).astype(jnp.float32)     # (TB,1)
        aspect = acc_ref[...] * inv_cnt                                 # (TB,H) f32
        pooled = pooled_ref[...].astype(jnp.float32)                    # (TB,H)
        logits = (
            jax.lax.dot_general(pooled, wp_ref[...],
                                dimension_numbers=(((1,), (1,)), ((), ())),
                                preferred_element_type=jnp.float32)
            + jax.lax.dot_general(aspect, wa_ref[...],
                                  dimension_numbers=(((1,), (1,)), ((), ())),
                                  preferred_element_type=jnp.float32)
            + b_ref[...]
        )
        out_ref[...] = logits.astype(out_ref.dtype)


def _vmem_budget():
    """Returns (vmem_limit_bytes or None, per-hidden-block byte budget)."""
    try:
        phys = int(pltpu.get_tpu_info().vmem_capacity_bytes)
    except Exception:
        # Unknown part: keep the compiler defaults and a conservative block.
        return None, 8 * 1024 * 1024
    if phys <= 64 * 1024 * 1024:            # v7x-class (64 MiB VMEM)
        return 48 * 1024 * 1024, 12 * 1024 * 1024
    return 96 * 1024 * 1024, 24 * 1024 * 1024   # v5e / v6e (128 MiB VMEM)


def _pick_tiles(B, S, H, itemsize, hid_block_budget, tb=None, ts=None):
    """Choose (TB, TS).

    TB: 8-aligned (or == B) so second-minor block dims stay legal; prefers
        >= 2 batch tiles when possible so v7x can shard the batch axis.
    TS: largest divisor-of-S block that keeps ONE hidden block under the
        per-block budget (budget already reflects the x2 double buffering).
    """
    if tb is None:
        if B % 16 == 0:
            tb = 8           # >= 2 batch tiles -> both v7x TensorCores get work
        elif B % 8 == 0:
            tb = 8
        else:
            tb = B           # single full-batch tile (block == full extent)
    if ts is None:
        ts = S
        while tb * ts * H * itemsize > hid_block_budget:
            nxt = ts // 2
            if nxt < 8 or S % nxt != 0 or nxt % 8 != 0:
                break        # cannot legally shrink further
            ts = nxt
    assert B % tb == 0 and (tb % 8 == 0 or tb == B), (B, tb)
    assert S % ts == 0 and (ts % 8 == 0 or ts == S), (S, ts)
    return tb, ts


def aspect_sentiment_forward(position_indices, last_hidden_state, pooled_output,
                             linear_weight, linear_bias, *, tb=None, ts=None):
    """position_indices: (B, 2) int   aspect span [start, end) per example
       last_hidden_state: (B, S, H)   bf16 or f32
       pooled_output: (B, H) f32
       linear_weight: (C, 2H) f32     (PyTorch nn.Linear convention)
       linear_bias: (C,) f32
       returns: (B, C) f32 logits
    """
    B, S, H = last_hidden_state.shape
    C = linear_weight.shape[0]
    itemsize = last_hidden_state.dtype.itemsize

    vmem_limit, hid_block_budget = _vmem_budget()
    tb, ts = _pick_tiles(B, S, H, itemsize, hid_block_budget, tb, ts)
    nb, nsb = B // tb, S // ts

    pos = position_indices.astype(jnp.int32)
    starts = pos[:, 0:1]                                       # (B, 1)
    ends = pos[:, 1:2]                                         # (B, 1)

    # Per-batch-tile union of the aspect spans, in sequence-block units
    # (scalar prefetch -> drives both the DMA clamp and the compute gate).
    st_c = jnp.clip(pos[:, 0], 0, S)
    en_c = jnp.clip(pos[:, 1], 0, S)
    first_ex = jnp.clip(st_c // ts, 0, nsb - 1)
    last_ex = jnp.clip((jnp.maximum(en_c, st_c + 1) - 1) // ts, 0, nsb - 1)
    blk_rng = jnp.stack(
        [jnp.min(first_ex.reshape(nb, tb), axis=1),
         jnp.max(last_ex.reshape(nb, tb), axis=1)],
        axis=1).astype(jnp.int32)                               # (nb, 2)

    # Keep the weight in (C, H) halves: hidden on the lane axis, no transpose.
    w = linear_weight.astype(jnp.float32)
    w_pooled = w[:, :H]                                         # (C, H)
    w_aspect = w[:, H:]                                         # (C, H)
    b_2d = linear_bias.reshape(1, C).astype(jnp.float32)        # (1, C)

    grid = (nb, nsb)

    cost = pl.CostEstimate(
        flops=2 * B * S * H + 2 * B * (2 * H) * C,
        transcendentals=0,
        bytes_accessed=(B * S * H * itemsize + B * H * 4
                        + 2 * H * C * 4 + C * 4 + B * C * 4),
    )

    kernel = functools.partial(aspect_sentiment_kernel, seq_len=S)

    cp_kwargs = dict(dimension_semantics=("parallel", "arbitrary"))
    if vmem_limit is not None:
        cp_kwargs["vmem_limit_bytes"] = vmem_limit

    return pl.pallas_call(
        kernel,
        out_shape=jax.ShapeDtypeStruct((B, C), jnp.float32),
        grid_spec=pltpu.PrefetchScalarGridSpec(
            num_scalar_prefetch=1,
            grid=grid,
            in_specs=[
                pl.BlockSpec((tb, 1), lambda b, s, rng: (b, 0)),          # starts
                pl.BlockSpec((tb, 1), lambda b, s, rng: (b, 0)),          # ends
                # Clamp the seq block index into this batch tile's span union:
                # repeated block indices => Pallas skips the hidden DMA.
                pl.BlockSpec((tb, ts, H),
                             lambda b, s, rng: (b, jnp.clip(s, rng[b, 0], rng[b, 1]), 0)),
                pl.BlockSpec((tb, H), lambda b, s, rng: (b, 0)),          # pooled
                pl.BlockSpec((C, H), lambda b, s, rng: (0, 0)),           # W (pooled half)
                pl.BlockSpec((C, H), lambda b, s, rng: (0, 0)),           # W (aspect half)
                pl.BlockSpec((1, C), lambda b, s, rng: (0, 0)),           # bias
            ],
            out_specs=pl.BlockSpec((tb, C), lambda b, s, rng: (b, 0)),
            scratch_shapes=[pltpu.VMEM((tb, H), jnp.float32)],
        ),
        compiler_params=pltpu.CompilerParams(**cp_kwargs),
        cost_estimate=cost,
    )(blk_rng, starts, ends, last_hidden_state, pooled_output,
      w_pooled, w_aspect, b_2d)


# -------- deterministic synthetic "bert" stub (plain-JAX glue) --------
def stub_bert(text_bert_indices, emb_table, pooler_w):
    """Returns (last_hidden_state (B,S,H), pooled_output (B,H))."""
    hidden = jnp.tanh(emb_table[text_bert_indices])            # (B, S, H)
    pooled = jnp.tanh(hidden[:, 0, :] @ pooler_w)              # (B, H)
    return hidden, pooled


def reference_forward(position_indices, last_hidden_state, pooled_output, w, b):
    """Pure-JAX reference mirroring the PyTorch forward (sanity check)."""
    B, S, H = last_hidden_state.shape
    hid = last_hidden_state.astype(jnp.float32)
    rows = []
    for i in range(B):
        s, e = int(position_indices[i, 0]), int(position_indices[i, 1])
        rows.append(jnp.mean(hid[i, s:e, :], axis=0))
    aspect = jnp.stack(rows, axis=0)
    feat = jnp.concatenate([pooled_output.astype(jnp.float32), aspect], axis=-1)
    return feat @ w.T + b


if __name__ == "__main__":
    key = jax.random.PRNGKey(0)
    B, S, H, C, VOCAB = 16, 64, 32, 3, 50   # bert_dim=32, sentiment_class=3

    k_emb, k_pool, k_w, k_b, k_tok = jax.random.split(key, 5)
    emb_table = jax.random.normal(k_emb, (VOCAB, H), dtype=jnp.float32) * 0.1
    pooler_w = jax.random.normal(k_pool, (H, H), dtype=jnp.float32) * 0.1
    linear_weight = jax.random.normal(k_w, (C, 2 * H), dtype=jnp.float32) * 0.1
    linear_bias = jax.random.normal(k_b, (C,), dtype=jnp.float32) * 0.1

    text_bert_indices = jax.random.randint(k_tok, (B, S), 0, VOCAB, dtype=jnp.int32)
    # With tb=8, ts=16: batch tile 0 spans live entirely in seq blocks 0-1
    # (blocks 2-3 are skipped: no DMA, no accumulate); batch tile 1 covers the
    # full sequence and exercises the end-past-S clamp.
    position_indices = jnp.array(
        [[1, 5], [6, 20], [0, 16], [3, 9], [17, 30], [2, 7], [24, 31], [8, 29],
         [0, 64], [3, 80], [32, 64], [7, 45], [48, 64], [0, 16], [20, 40], [60, 70]],
        dtype=jnp.int32)

    last_hidden_state, pooled_output = stub_bert(text_bert_indices, emb_table, pooler_w)
    # Stream activations in bf16 (halves HBM traffic); accumulation is f32 in-kernel.
    last_hidden_state = last_hidden_state.astype(jnp.bfloat16)

    out = aspect_sentiment_forward(position_indices, last_hidden_state, pooled_output,
                                   linear_weight, linear_bias, ts=16)
    out = jax.block_until_ready(out)

    ref = reference_forward(position_indices, last_hidden_state, pooled_output,
                            linear_weight, linear_bias)
    assert out.shape == (B, C)
    assert jnp.allclose(out, ref, atol=1e-4, rtol=1e-4), (out, ref)

    print("KERNEL_OK")
</pallas_src>

<mosaic_0001>
module attributes {stable_mosaic.version = 11 : i64} {
  func.func @aspect_sentiment_kernel(%arg0: i32, %arg1: i32, %arg2: memref<2x2xi32, #tpu.memory_space<smem>>, %arg3: memref<8x1xi32, #tpu.memory_space<vmem>>, %arg4: memref<8x1xi32, #tpu.memory_space<vmem>>, %arg5: memref<8x16x32xbf16, #tpu.memory_space<vmem>>, %arg6: memref<8x32xf32, #tpu.memory_space<vmem>>, %arg7: memref<3x32xf32, #tpu.memory_space<vmem>>, %arg8: memref<3x32xf32, #tpu.memory_space<vmem>>, %arg9: memref<1x3xf32, #tpu.memory_space<vmem>>, %arg10: memref<8x3xf32, #tpu.memory_space<vmem>>, %arg11: memref<8x32xf32, #tpu.memory_space<vmem>>) attributes {dimension_semantics = [#tpu.dimension_semantics<parallel>, #tpu.dimension_semantics<arbitrary>], iteration_bounds = array<i64: 2, 4>, scalar_prefetch = 1 : i64, scratch_operands = 1 : i64, tpu.core_type = #tpu.core_type<tc>, window_params = [{transform_indices = @transform_0, window_bounds = array<i64: 8, 1>}, {transform_indices = @transform_1, window_bounds = array<i64: 8, 1>}, {transform_indices = @transform_2, window_bounds = array<i64: 8, 16, 32>}, {transform_indices = @transform_3, window_bounds = array<i64: 8, 32>}, {pipeline_mode = #tpu.pipeline_mode<synchronous>, transform_indices = @transform_4, window_bounds = array<i64: 3, 32>}, {pipeline_mode = #tpu.pipeline_mode<synchronous>, transform_indices = @transform_5, window_bounds = array<i64: 3, 32>}, {pipeline_mode = #tpu.pipeline_mode<synchronous>, transform_indices = @transform_6, window_bounds = array<i64: 1, 3>}, {transform_indices = @transform_7, window_bounds = array<i64: 8, 3>}]} {
    %c0_i32 = arith.constant 0 : i32
    %0 = arith.cmpi eq, %arg1, %c0_i32 : i32
    %1 = arith.extui %0 : i1 to i32
    %c0_i32_0 = arith.constant 0 : i32
    %2 = arith.cmpi ne, %1, %c0_i32_0 : i32
    scf.if %2 {
      %cst = arith.constant 0.000000e+00 : f32
      %15 = vector.broadcast %cst : f32 to vector<8x32xf32>
      %c0_3 = arith.constant 0 : index
      %c0_4 = arith.constant 0 : index
      %16 = vector.load %arg11[%c0_3, %c0_4] : memref<8x32xf32, #tpu.memory_space<vmem>>, vector<8x32xf32>
      tpu.vector_store %arg11[%c0_3, %c0_4], %15 {strides = array<i32>} : memref<8x32xf32, #tpu.memory_space<vmem>>, vector<8x32xf32>,
    } else {
    }
    %3 = arith.index_cast %arg0 : i32 to index
    %c0 = arith.constant 0 : index
    %4 = memref.load %arg2[%3, %c0] : memref<2x2xi32, #tpu.memory_space<smem>>
    %5 = arith.cmpi sge, %arg1, %4 : i32
    %6 = arith.index_cast %arg0 : i32 to index
    %c1 = arith.constant 1 : index
    %7 = memref.load %arg2[%6, %c1] : memref<2x2xi32, #tpu.memory_space<smem>>
    %8 = arith.cmpi sle, %arg1, %7 : i32
    %9 = arith.andi %5, %8 : i1
    %10 = arith.extui %9 : i1 to i32
    %c0_i32_1 = arith.constant 0 : i32
    %11 = arith.cmpi ne, %10, %c0_i32_1 : i32
    scf.if %11 {
      %c0_3 = arith.constant 0 : index
      %c0_4 = arith.constant 0 : index
      %15 = vector.load %arg3[%c0_3, %c0_4] : memref<8x1xi32, #tpu.memory_space<vmem>>, vector<8x1xi32>
      %c0_i32_5 = arith.constant 0 : i32
      %c64_i32 = arith.constant 64 : i32
      %16 = vector.broadcast %c0_i32_5 : i32 to vector<8x1xi32>
      %17 = arith.maxsi %16, %15 : vector<8x1xi32>
      %18 = vector.broadcast %c64_i32 : i32 to vector<8x1xi32>
      %19 = arith.minsi %18, %17 : vector<8x1xi32>
      %20 = vector.shape_cast %19 : vector<8x1xi32> to vector<8x1x1xi32>
      %c0_6 = arith.constant 0 : index
      %c0_7 = arith.constant 0 : index
      %21 = vector.load %arg4[%c0_6, %c0_7] : memref<8x1xi32, #tpu.memory_space<vmem>>, vector<8x1xi32>
      %c0_i32_8 = arith.constant 0 : i32
      %c64_i32_9 = arith.constant 64 : i32
      %22 = vector.broadcast %c0_i32_8 : i32 to vector<8x1xi32>
      %23 = arith.maxsi %22, %21 : vector<8x1xi32>
      %24 = vector.broadcast %c64_i32_9 : i32 to vector<8x1xi32>
      %25 = arith.minsi %24, %23 : vector<8x1xi32>
      %26 = vector.shape_cast %25 : vector<8x1xi32> to vector<8x1x1xi32>
      %27 = tpu.iota {dimensions = array<i32: 2>} : vector<8x1x16xi32>
      %c16_i32 = arith.constant 16 : i32
      %28 = arith.muli %arg1, %c16_i32 : i32
      %29 = vector.broadcast %28 : i32 to vector<8x1x16xi32>
      %30 = arith.addi %27, %29 : vector<8x1x16xi32>
      %31 = vector.broadcast %20 : vector<8x1x1xi32> to vector<8x1x16xi32>
      %32 = arith.cmpi sge, %30, %31 : vector<8x1x16xi32>
      %33 = vector.broadcast %26 : vector<8x1x1xi32> to vector<8x1x16xi32>
      %34 = arith.cmpi slt, %30, %33 : vector<8x1x16xi32>
      %35 = arith.andi %32, %34 : vector<8x1x16xi1>
      %36 = arith.extui %35 : vector<8x1x16xi1> to vector<8x1x16xi32>
      %37 = arith.sitofp %36 : vector<8x1x16xi32> to vector<8x1x16xf32>
      %38 = arith.truncf %37 : vector<8x1x16xf32> to vector<8x1x16xbf16>
      %c0_10 = arith.constant 0 : index
      %c0_11 = arith.constant 0 : index
      %c0_12 = arith.constant 0 : index
      %39 = vector.load %arg5[%c0_10, %c0_11, %c0_12] : memref<8x16x32xbf16, #tpu.memory_space<vmem>>, vector<8x16x32xbf16>
      %cst = arith.constant dense<0.000000e+00> : vector<8x1x32xf32>
      %40 = tpu.matmul %38, %39, %cst {dimension_numbers = #tpu.dot_dimension_numbers<[2], [1], [1], [2], [0, 0, 0, 1, 1, 2], [0], [0]>} : vector<8x1x16xbf16>, vector<8x16x32xbf16>, vector<8x1x32xf32> -> vector<8x1x32xf32>
      %c0_13 = arith.constant 0 : index
      %c0_14 = arith.constant 0 : index
      %41 = vector.load %arg11[%c0_13, %c0_14] : memref<8x32xf32, #tpu.memory_space<vmem>>, vector<8x32xf32>
      %42 = vector.shape_cast %40 : vector<8x1x32xf32> to vector<8x32xf32>
      %43 = arith.addf %41, %42 : vector<8x32xf32>
      %c0_15 = arith.constant 0 : index
      %c0_16 = arith.constant 0 : index
      %44 = vector.load %arg11[%c0_15, %c0_16] : memref<8x32xf32, #tpu.memory_space<vmem>>, vector<8x32xf32>
      tpu.vector_store %arg11[%c0_15, %c0_16], %43 {strides = array<i32>} : memref<8x32xf32, #tpu.memory_space<vmem>>, vector<8x32xf32>,
    } else {
    }
    %c3_i32 = arith.constant 3 : i32
    %12 = arith.cmpi eq, %arg1, %c3_i32 : i32
    %13 = arith.extui %12 : i1 to i32
    %c0_i32_2 = arith.constant 0 : i32
    %14 = arith.cmpi ne, %13, %c0_i32_2 : i32
    scf.if %14 {
      %c0_3 = arith.constant 0 : index
      %c0_4 = arith.constant 0 : index
      %15 = vector.load %arg3[%c0_3, %c0_4] : memref<8x1xi32, #tpu.memory_space<vmem>>, vector<8x1xi32>
      %c0_i32_5 = arith.constant 0 : i32
      %c64_i32 = arith.constant 64 : i32
      %16 = vector.broadcast %c0_i32_5 : i32 to vector<8x1xi32>
      %17 = arith.maxsi %16, %15 : vector<8x1xi32>
      %18 = vector.broadcast %c64_i32 : i32 to vector<8x1xi32>
      %19 = arith.minsi %18, %17 : vector<8x1xi32>
      %c0_6 = arith.constant 0 : index
      %c0_7 = arith.constant 0 : index
      %20 = vector.load %arg4[%c0_6, %c0_7] : memref<8x1xi32, #tpu.memory_space<vmem>>, vector<8x1xi32>
      %c0_i32_8 = arith.constant 0 : i32
      %c64_i32_9 = arith.constant 64 : i32
      %21 = vector.broadcast %c0_i32_8 : i32 to vector<8x1xi32>
      %22 = arith.maxsi %21, %20 : vector<8x1xi32>
      %23 = vector.broadcast %c64_i32_9 : i32 to vector<8x1xi32>
      %24 = arith.minsi %23, %22 : vector<8x1xi32>
      %25 = arith.subi %24, %19 : vector<8x1xi32>
      %c1_i32 = arith.constant 1 : i32
      %26 = vector.broadcast %c1_i32 : i32 to vector<8x1xi32>
      %27 = arith.maxsi %25, %26 : vector<8x1xi32>
      %28 = arith.sitofp %27 : vector<8x1xi32> to vector<8x1xf32>
      %cst = arith.constant 1.000000e+00 : f32
      %29 = vector.broadcast %cst : f32 to vector<8x1xf32>
      %30 = arith.divf %29, %28 : vector<8x1xf32>
      %c0_10 = arith.constant 0 : index
      %c0_11 = arith.constant 0 : index
      %31 = vector.load %arg11[%c0_10, %c0_11] : memref<8x32xf32, #tpu.memory_space<vmem>>, vector<8x32xf32>
      %32 = vector.broadcast %30 : vector<8x1xf32> to vector<8x32xf32>
      %33 = arith.mulf %31, %32 : vector<8x32xf32>
      %c0_12 = arith.constant 0 : index
      %c0_13 = arith.constant 0 : index
      %34 = vector.load %arg6[%c0_12, %c0_13] : memref<8x32xf32, #tpu.memory_space<vmem>>, vector<8x32xf32>
      %c0_14 = arith.constant 0 : index
      %c0_15 = arith.constant 0 : index
      %35 = vector.load %arg7[%c0_14, %c0_15] : memref<3x32xf32, #tpu.memory_space<vmem>>, vector<3x32xf32>
      %cst_16 = arith.constant dense<0.000000e+00> : vector<8x3xf32>
      %36 = tpu.matmul %34, %35, %cst_16 {dimension_numbers = #tpu.dot_dimension_numbers<[1], [1], [0], [0], [0, 0, 1, 0], [], []>} : vector<8x32xf32>, vector<3x32xf32>, vector<8x3xf32> -> vector<8x3xf32>
      %c0_17 = arith.constant 0 : index
      %c0_18 = arith.constant 0 : index
      %37 = vector.load %arg8[%c0_17, %c0_18] : memref<3x32xf32, #tpu.memory_space<vmem>>, vector<3x32xf32>
      %cst_19 = arith.constant dense<0.000000e+00> : vector<8x3xf32>
      %38 = tpu.matmul %33, %37, %cst_19 {dimension_numbers = #tpu.dot_dimension_numbers<[1], [1], [0], [0], [0, 0, 1, 0], [], []>} : vector<8x32xf32>, vector<3x32xf32>, vector<8x3xf32> -> vector<8x3xf32>
      %39 = arith.addf %36, %38 : vector<8x3xf32>
      %c0_20 = arith.constant 0 : index
      %c0_21 = arith.constant 0 : index
      %40 = vector.load %arg9[%c0_20, %c0_21] : memref<1x3xf32, #tpu.memory_space<vmem>>, vector<1x3xf32>
      %41 = vector.broadcast %40 : vector<1x3xf32> to vector<8x3xf32>
      %42 = arith.addf %39, %41 : vector<8x3xf32>
      %c0_22 = arith.constant 0 : index
      %c0_23 = arith.constant 0 : index
      %43 = vector.load %arg10[%c0_22, %c0_23] : memref<8x3xf32, #tpu.memory_space<vmem>>, vector<8x3xf32>
      tpu.vector_store %arg10[%c0_22, %c0_23], %42 {strides = array<i32>} : memref<8x3xf32, #tpu.memory_space<vmem>>, vector<8x3xf32>,
    } else {
    }
    return
  }
  func.func @transform_0(%arg0: i32, %arg1: i32, %arg2: memref<2x2xi32, #tpu.memory_space<smem>>) -> (i32, i32) {
    %c0_i32 = arith.constant 0 : i32
    %c0_i32_0 = arith.constant 0 : i32
    return %arg0, %c0_i32 : i32, i32
  }
  func.func @transform_1(%arg0: i32, %arg1: i32, %arg2: memref<2x2xi32, #tpu.memory_space<smem>>) -> (i32, i32) {
    %c0_i32 = arith.constant 0 : i32
    %c0_i32_0 = arith.constant 0 : i32
    return %arg0, %c0_i32 : i32, i32
  }
  func.func @transform_2(%arg0: i32, %arg1: i32, %arg2: memref<2x2xi32, #tpu.memory_space<smem>>) -> (i32, i32, i32) {
    %0 = arith.index_cast %arg0 : i32 to index
    %c0 = arith.constant 0 : index
    %1 = memref.load %arg2[%0, %c0] : memref<2x2xi32, #tpu.memory_space<smem>>
    %2 = arith.index_cast %arg0 : i32 to index
    %c1 = arith.constant 1 : index
    %3 = memref.load %arg2[%2, %c1] : memref<2x2xi32, #tpu.memory_space<smem>>
    %4 = arith.maxsi %1, %arg1 : i32
    %5 = arith.minsi %3, %4 : i32
    %c0_i32 = arith.constant 0 : i32
    %c0_i32_0 = arith.constant 0 : i32
    return %arg0, %5, %c0_i32 : i32, i32, i32
  }
  func.func @transform_3(%arg0: i32, %arg1: i32, %arg2: memref<2x2xi32, #tpu.memory_space<smem>>) -> (i32, i32) {
    %c0_i32 = arith.constant 0 : i32
    %c0_i32_0 = arith.constant 0 : i32
    return %arg0, %c0_i32 : i32, i32
  }
  func.func @transform_4(%arg0: i32, %arg1: i32, %arg2: memref<2x2xi32, #tpu.memory_space<smem>>) -> (i32, i32) {
    %c0_i32 = arith.constant 0 : i32
    %c0_i32_0 = arith.constant 0 : i32
    %c0_i32_1 = arith.constant 0 : i32
    return %c0_i32, %c0_i32_0 : i32, i32
  }
  func.func @transform_5(%arg0: i32, %arg1: i32, %arg2: memref<2x2xi32, #tpu.memory_space<smem>>) -> (i32, i32) {
    %c0_i32 = arith.constant 0 : i32
    %c0_i32_0 = arith.constant 0 : i32
    %c0_i32_1 = arith.constant 0 : i32
    return %c0_i32, %c0_i32_0 : i32, i32
  }
  func.func @transform_6(%arg0: i32, %arg1: i32, %arg2: memref<2x2xi32, #tpu.memory_space<smem>>) -> (i32, i32) {
    %c0_i32 = arith.constant 0 : i32
    %c0_i32_0 = arith.constant 0 : i32
    %c0_i32_1 = arith.constant 0 : i32
    return %c0_i32, %c0_i32_0 : i32, i32
  }
  func.func @transform_7(%arg0: i32, %arg1: i32, %arg2: memref<2x2xi32, #tpu.memory_space<smem>>) -> (i32, i32) {
    %c0_i32 = arith.constant 0 : i32
    %c0_i32_0 = arith.constant 0 : i32
    return %arg0, %c0_i32 : i32, i32
  }
}

</mosaic_0001>

<bundles_post_ra>
// kernel: tpu_custom_call.1
= control target key start
LH: loop header
LB: loop body
LE: loop exit
PB: predicated region body
PF: predicated region fallthrough
CT: control target
= control target key end

     0   :  { %s2121_s0 = inlined_call_operand.vmem [shape: s32[2,2], index: 0, kind: input, shape index: {}]   ;;  %s2122_s1 = inlined_call_operand.vmem [shape: s32[16,1], index: 1, kind: input, shape index: {}]   ;;  %s2123_s2 = inlined_call_operand.vmem [shape: s32[16,1], index: 2, kind: input, shape index: {}]   ;;  %s2124_s3 = inlined_call_operand.vmem [shape: bf16[16,64,32], index: 3, kind: input, shape index: {}]   ;;  %s2125_s4 = inlined_call_operand.vmem [shape: f32[16,32], index: 4, kind: input, shape index: {}]   ;;  %s2126_s5 = inlined_call_operand.vmem [shape: f32[3,32], index: 5, kind: input, shape index: {}]   ;;  %s2127_s6 = inlined_call_operand.vmem [shape: f32[3,32], index: 6, kind: input, shape index: {}]   ;;  %s2128_s7 = inlined_call_operand.vmem [shape: f32[1,3], index: 7, kind: input, shape index: {}]   ;;  %s2129_s8 = inlined_call_operand.vmem [shape: f32[16,3], index: 8, kind: output, shape index: {}]  }
   0x1   :  { %s13_s29 = sshll.u32 %s2121_s0, 4  ;;  %s14_s29 = int_to_ptr.vmem [resolvable:$true] %s13_s29 }
   0x2   :  { %s1735_s30 = scalar_lea.vmem %s14_s29, 32  ;;  %p1740_p1 = scmp.lt.s32.totalorder %s14_s29, %s14_s29 }
   0x3   :  { %p1736_p0 = scmp.ne.s32.totalorder %s14_s29, %s1735_s30  ;;  %p1741_p2 = scmp.lt.s32.totalorder %s1735_s30, %s1735_s30 }
   0x5   :  { %p1742_p3 = por %p1741_p2, %p1740_p1 }
   0x7   :  { %p1743_p4 = pnand %p1742_p3, %p1736_p0 }
   0x9   :  { %1746 = shalt.err (!%p1743_p4)  }
   0xa   :  { %s1805_s9 = smov [#allocation4]  }
   0xb   :  { %16 = dma.vmem_to_smem %s14_s29, 32, %s1805_s9, [#allocation3] }
   0xc   :  { %1775 = dma.done.wait [#allocation3], 32 }
   0xd   :  { %1776 = vsyncadd [#allocation3], 4294967264 }
   0xe   :  { %18 = sfence }
   0xf   :  { %s1862_s10 = smov 0   ;;  %s1864_s11 = smov 0  }
  0x10   :  { %s1866_s12 = smov 0   ;;  %s1868_s0 = smov 0  }
  0x11   :  { %s1870_s13 = smov 0   ;;  %s1872_s14 = smov 0  }
  0x12   :  { %s1874_s15 = smov 0  }
  0x13 LB: > { %s33_s16 = sadd.s32 1, %s1795_s13  ;;  %s36_s17 = sadd.s32 1, %s1799_s14  ;;  %s1803_s15 = sphi %s1874_s15, %s24_s15   ;;  %s1799_s14 = sphi %s1872_s14, %s2141_s14   ;;  %s1795_s13 = sphi %s1870_s13, %s2140_s13   ;;  %s1791_s0 = sphi %s1868_s0, %s2139_s0   ;;  %s1787_s12 = sphi %s1866_s12, %s2138_s12   ;;  %s1783_s11 = sphi %s1864_s11, %s2137_s11   ;;  %s1779_s10 = sphi %s1862_s10, %s2136_s10  }
  0x14   : > { %p34_p5 = scmp.ge.s32.totalorder %s33_s16, 4  ;;  %s1900_s18 = sshll.u32 %s1799_s14, 7 }
  0x15   : > { %s93_s19 = sld [smem:[#allocation4 + %s1900_s18]]  ;;  %s94_s20 = sadd.s32 1, %s1900_s18 }
  0x16   : > { %s2143_s17 = smov (!%p34_p5, %s36_s17), %s1799_s14  ;;  %p120_p7 = scmp.ne.s32.totalorder %s1783_s11, %s1779_s10 }
  0x17   : > { %p38_p6 = scmp.ge.s32.totalorder %s2143_s17, 2  ;;  %s95_s21 = sld [smem:[#allocation4 + %s94_s20]] }
  0x18   : > { %p121_p8 = scmp.eq.s32.totalorder %s1803_s15, 0  ;;  %s2147_s16 = smov (%p34_p5, %s33_s16), 0 }
  0x19   : > { %s2145_s17 = smov (%p38_p6, %s2143_s17), 0  ;;  %s113_s30 = sadd.s32 1, %s1783_s11 }
  0x1a   : > { %2131 = sst [smem:[#allocation7_spill]] %s2145_s17  ;;  %p1913_p10 = por %p121_p8, %p120_p7 }
  0x1b   : > { %p96_p9 = scmp.gt.s32.totalorder %s93_s19, %s1795_s13  ;;  %s1528_s23 = sshll.u32 %s2145_s17, 7 }
  0x1c   : > { %s101_s24 = sld [smem:[#allocation4 + %s1528_s23]]  ;;  %s102_s25 = sadd.s32 1, %s1528_s23 }
  0x1d   : > { %s2149_s19 = smov (!%p96_p9, %s93_s19), %s1795_s13  ;;  %s103_s26 = sld [smem:[#allocation4 + %s102_s25]] }
  0x1e   : > { %p98_p11 = scmp.lt.s32.totalorder %s95_s21, %s2149_s19  ;;  %s108_s27 = ssub.s32 %s1799_s14, %s2145_s17 }
  0x1f   : > { %p1530_p1 = scmp.ge.s32.totalorder %s1803_s15, 8 }
  0x20   : > { %s2153_s21 = smov (!%p98_p11, %s95_s21), %s2149_s19 }
  0x22   : > { %p104_p12 = scmp.gt.s32.totalorder %s101_s24, %s2147_s16 }
  0x24   : > { %s2151_s24 = smov (!%p104_p12, %s101_s24), %s2147_s16 }
  0x25   : > { %p106_p13 = scmp.lt.s32.totalorder %s103_s26, %s2151_s24 }
  0x27   : > { %s2155_s26 = smov (!%p106_p13, %s103_s26), %s2151_s24 }
  0x28   : > { %s109_s28 = ssub.s32 %s2153_s21, %s2155_s26  ;;  %270 = sbr.rel (%p1530_p1) target bundleno = 70 (0x46), region = 28 }
  0x29   : > { %s110_s29 = sor.u32 %s109_s28, %s108_s27 }
  0x2a   : > { %p111_p0 = scmp.eq.s32.totalorder %s110_s29, 0 }
  0x2c   : > { %s1927_s9 = scalar_select %p111_p0, %s1783_s11, %s113_s30  }
  0x2d   : > { %287 = sbr.rel (!%p1913_p10) target bundleno = 70 (0x46), region = 40  ;;  %s293_s19 = sld [smem:[#allocation4 + %s1900_s18]] (%p1913_p10) }
  0x2e   : > { %s295_s21 = sld [smem:[#allocation4 + %s94_s20]] (%p1913_p10)  ;;  %s289_s23 = sand.u32 (%p1913_p10), 1, %s1783_s11  }
  0x2f   : > { %s1578_s24 = sshll.u32 (%p1913_p10), %s1799_s14, 6  ;;  %s1531_s25 = sshll.u32 (%p1913_p10), %s289_s23, 6 }
  0x30   : > { %s291_s17 = scalar_lea.vmem (%p1913_p10), [#allocation5], %s1531_s25 }
  0x33   : > { %p296_p2 = scmp.gt.s32.totalorder %s293_s19, %s1795_s13 }
  0x35   : > { %s2157_s19 = smov (!%p296_p2, %s293_s19), %s1795_s13 }
  0x36   : > { %p298_p3 = scmp.lt.s32.totalorder %s295_s21, %s2157_s19 }
  0x38   : > { %s2159_s21 = smov (!%p298_p3, %s295_s21), %s2157_s19 }
  0x39   : > { %s1534_s26 = sshll.u32 %s2159_s21, 1 }
  0x3a   : > { %s303_s27 = sadd.s32 %s1578_s24, %s1534_s26 }
  0x3b   : > { %s1536_s22 = sshll.u32 %s303_s27, 2 }
  0x3c   : > { %s305_s30 = scalar_lea.vmem %s2124_s3, %s1536_s22 }
  0x3d   : > { %v322_v0 = vld [vmem:[%s305_s30] sm:$0xff]  }
  0x3e   : > { %v326_v1 = vld [vmem:[%s305_s30 + $0x20] sm:$0xff]   ;;  %323 = vst [vmem:[%s291_s17] sm:$0xff] %v322_v0  }
  0x3f   : > { %v330_v2 = vld [vmem:[%s305_s30 + $0x40] sm:$0xff]   ;;  %327 = vst [vmem:[%s291_s17 + $0x8] sm:$0xff] %v326_v1  }
  0x40   : > { %331 = vst [vmem:[%s291_s17 + $0x10] sm:$0xff] %v330_v2   ;;  %v334_v3 = vld [vmem:[%s305_s30 + $0x60] sm:$0xff]  }
  0x41   : > { %v338_v4 = vld [vmem:[%s305_s30 + $0x80] sm:$0xff]   ;;  %335 = vst [vmem:[%s291_s17 + $0x18] sm:$0xff] %v334_v3  }
  0x42   : > { %v342_v5 = vld [vmem:[%s305_s30 + $0xa0] sm:$0xff]   ;;  %339 = vst [vmem:[%s291_s17 + $0x20] sm:$0xff] %v338_v4  }
  0x43   : > { %343 = vst [vmem:[%s291_s17 + $0x28] sm:$0xff] %v342_v5   ;;  %v346_v6 = vld [vmem:[%s305_s30 + $0xc0] sm:$0xff]  }
  0x44   : > { %v350_v7 = vld [vmem:[%s305_s30 + $0xe0] sm:$0xff]   ;;  %347 = vst [vmem:[%s291_s17 + $0x30] sm:$0xff] %v346_v6  }
  0x45   : > { %351 = vst [vmem:[%s291_s17 + $0x38] sm:$0xff] %v350_v7  }
  0x46 PF: > { %p1537_p4 = scmp.ge.s32.totalorder %s1803_s15, 1  ;;  %p415_p5 = scmp.lt.s32.totalorder %s1803_s15, 9 }
  0x48   : > { %p416_p6 = pnand %p1537_p4, %p415_p5 }
  0x49   : > { %s422_s18 = sand.u32 (!%p416_p6), 1, %s1779_s10   ;;  %p464_p7 = scmp.lt.s32.totalorder (!%p416_p6), %s1791_s0, 1 }
  0x4a   : > { %419 = sbr.rel (%p416_p6) target bundleno = 832 (0x340), region = 85  ;;  %s1538_s20 = sshll.u32 (!%p416_p6), %s422_s18, 6 }
  0x4b   : > { %p1543_p8 = scmp.ne.s32.totalorder (!%p416_p6), %s1787_s12, 0 }
  0x4f   : > { %s465_s19 = scalar_select %p464_p7, %s1791_s0, 1 }
  0x50   : > { %494 = sbr.rel (%p1543_p8) target bundleno = 87 (0x57), region = 93 }
  0x51   : > { %s1947_s21 = sshll.u32 %s465_s19, 3  ;;  %s1969_s19 = scalar_lea.vmem [#allocation5], %s1538_s20 }
  0x52   : > { %s1953_s24 = scalar_lea.vmem %s2122_s1, %s1947_s21  ;;  %s1959_s27 = scalar_lea.vmem %s2123_s2, %s1947_s21 }
  0x53   : > { %s485_s28 = scalar_lea.vmem %s2125_s4, %s1947_s21  ;;  %s489_s18 = scalar_lea.vmem %s2129_s8, %s1947_s21 }
  0x55   : > { %vm495_vm0 = vcmask 261120   ;;  %v1806_v8 = vmov 0.0  }
  0x56   : > { %496 = vst.msk [vmem:[#allocation2] sm:$0xff] %vm495_vm0, %v1806_v8 }
  0x57 PF: > { %s1544_s23 = sshll.u32 %s1791_s0, 7 }
  0x58   : > { %s498_s17 = sld [smem:[#allocation4 + %s1544_s23]]  ;;  %s500_s25 = sadd.s32 1, %s1544_s23 }
  0x59   : > { %s501_s26 = sld [smem:[#allocation4 + %s500_s25]] }
  0x5e   : > { %p499_p9 = scmp.ge.s32.totalorder %s1787_s12, %s498_s17 }
  0x5f   : > { %p502_p10 = scmp.le.s32.totalorder %s1787_s12, %s501_s26 }
  0x61   : > { %p503_p11 = pnand %p502_p10, %p499_p9 }
  0x62   : > { %s1545_s0 = sshll.u32 (!%p503_p11), %s1787_s12, 4 }
  0x63   : > { %506 = sbr.rel (%p503_p11) target bundleno = 475 (0x1db), region = 97 }
  0x68   : > { %v507_v9 = vld [vmem:[%s1953_s24] sm:$0xff]  ;;  %v516_v10 = vlaneseq  ;;  %v1807_v12 = vmov 0   ;;  %v1808_v13 = vmov 1966171168   ;;  %v1724_v30 = vld [vmem:[%s1969_s19] sm:$0xff]   ;;  %v1809_v31 = vmov 0.0  }
  0x69   : > { %v561_v11 = vld [vmem:[%s1959_s27] sm:$0xff]  ;;  %1722 = vset.pattern.permute.xlu0 %v1807_v12  ;;  %vm508_vm1 = vcmp.gt.s32.totalorder %v507_v9, 0  ;;  %v514_v14 = vunpack.c.l.s4 %v1808_v13  ;;  %1723 = vset.pattern.permute.xlu1 %v1807_v12  ;;  %v1725_v34 = vld [vmem:[%s1969_s19 + $0x8] sm:$0xff]   ;;  %vm1810_vm5 = vmmov 0   ;;  %v618_v52 = vstv %s1545_s0  ;;  %v1726_v3 = vld [vmem:[%s1969_s19 + $0x10] sm:$0xff]  }
  0x6a   : > { %vm562_vm2 = vcmp.gt.s32.totalorder %v561_v11, 0  ;;  %v509_v15 = vsel %vm508_vm1, %v507_v9, 0  ;;  %v1978_v16 = vshrl.u32 %v516_v10, 7  ;;  %1599 = vmatprep.subr.bf16.mxu0 %v1809_v31  ;;  %1605 = vmatprep.subr.bf16.mxu1 %v1809_v31  ;;  %v616_v51 = vand.u32 127, %v516_v10  ;;  %v1727_v8 = vld [vmem:[%s1969_s19 + $0x18] sm:$0xff]  }
  0x6b   : > { %v563_v17 = vsel %vm562_vm2, %v561_v11, 0  ;;  %vm510_vm3 = vcmp.lt.s32.totalorder %v509_v15, 64  ;;  %v515_v18 = vunpack.c.0.s8 %v514_v14  ;;  %1600 = vmatpush3.bf16.msra.mxu0 %v1724_v30  ;;  %1606 = vmatpush3.bf16.msra.mxu1 %v1725_v34  ;;  %vm802_vm11 = vcmask 130048  }
  0x6c   : > { %vm564_vm4 = vcmp.lt.s32.totalorder %v563_v17, 64  ;;  %v511_v19 = vsel %vm510_vm3, %v509_v15, 64  ;;  %1611 = vmatprep.subr.bf16.mxu0 %v1809_v31  ;;  %1601 = vmatprep.mubr.msk.bf16.mxu0 %vm1810_vm5, %v1809_v31  ;;  %v1994_v53 = vsub.s32 0, %v1978_v16  ;;  %v1996_v54 = vadd.s32 %v618_v52, %v616_v51 }
  0x6d   : > { %v565_v20 = vsel %vm564_vm4, %v563_v17, 64  ;;  %v518_v21 = vsub.s32 %v515_v18, %v1978_v16  ;;  %v512_v32 = vcombine.high %v511_v19, %v511_v19  ;;  %1607 = vmatprep.mubr.msk.bf16.mxu1 %vm1810_vm5, %v1809_v31  ;;  %1617 = vmatprep.subr.bf16.mxu1 %v1809_v31  ;;  %v1728_v17 = vld [vmem:[%s1969_s19 + $0x20] sm:$0xff]  }
  0x6e   : > { %v566_v36 = vcombine.high %v565_v20, %v565_v20 }
  0x6f   : > { %v519_v22 = vrot.slane %v511_v19, %v518_v21  ;;  %v573_v23 = vrot.slane %v565_v20, %v518_v21  ;;  %v526_v38 = vrot.slane %v512_v32, %v518_v21  ;;  %v1730_v32 = vld [vmem:[%s1969_s19 + $0x30] sm:$0xff]  }
  0x70   : > { %v580_v40 = vrot.slane %v566_v36, %v518_v21 }
  0x71   : > { %v535_v24 = vrot.slane %v519_v22, %v518_v21  ;;  %v527_v25 = vcombine.high %v519_v22, %v519_v22  ;;  %v581_v26 = vcombine.high %v573_v23, %v573_v23  ;;  %v589_v28 = vrot.slane %v573_v23, %v518_v21  ;;  %v1729_v22 = vld [vmem:[%s1969_s19 + $0x28] sm:$0xff]  }
  0x72   : > { %v542_v41 = vrot.slane %v526_v38, %v518_v21  ;;  %v528_v42 = vcombine.high %v526_v38, %v526_v38  ;;  %v596_v43 = vrot.slane %v580_v40, %v518_v21  ;;  %v582_v44 = vcombine.high %v580_v40, %v580_v40 }
  0x73   : > { %621 = vperm.xlu0 %1722, %v535_v24   ;;  %v549_v27 = vrot.slane %v527_v25, %v518_v21  ;;  %v603_v29 = vrot.slane %v581_v26, %v518_v21  ;;  %v557_v33 = vcombine.high %v535_v24, %v535_v24  ;;  %v611_v35 = vcombine.high %v589_v28, %v589_v28 }
  0x74   : > { %v556_v45 = vrot.slane %v528_v42, %v518_v21  ;;  %v610_v46 = vrot.slane %v582_v44, %v518_v21  ;;  %v558_v47 = vcombine.high %v542_v41, %v542_v41  ;;  %v612_v48 = vcombine.high %v596_v43, %v596_v43 }
  0x75   : > { %628 = vperm.xlu1 %1723, %v549_v27   ;;  %v559_v37 = vcombine.high %v549_v27, %v549_v27  ;;  %v613_v39 = vcombine.high %v603_v29, %v603_v29 }
  0x76   : > { %v560_v49 = vcombine.high %v556_v45, %v556_v45  ;;  %v614_v50 = vcombine.high %v610_v46, %v610_v46 }
  0x77   : > { %685 = vperm.xlu0 %1722, %v589_v28  }
  0x79   : > { %692 = vperm.xlu1 %1723, %v603_v29  }
  0x7b   : > { %635 = vperm.xlu0 %1722, %v557_v33  }
  0x7d   : > { %699 = vperm.xlu1 %1723, %v611_v35  }
  0x7f   : > { %642 = vperm.xlu0 %1722, %v559_v37   ;;  %v1731_v37 = vld [vmem:[%s1969_s19 + $0x38] sm:$0xff]  }
  0x81   : > { %706 = vperm.xlu1 %1723, %v613_v39  }
  0x83   : > { %649 = vperm.xlu0 %1722, %v542_v41  }
  0x85   : > { %713 = vperm.xlu1 %1723, %v596_v43  }
  0x87   : > { %656 = vperm.xlu0 %1722, %v556_v45  }
  0x89   : > { %720 = vperm.xlu1 %1723, %v610_v46  }
  0x8b   : > { %663 = vperm.xlu0 %1722, %v558_v47  }
  0x8d   : > { %727 = vperm.xlu1 %1723, %v612_v48  }
  0x8f   : > { %670 = vperm.xlu0 %1722, %v560_v49  }
  0x91   : > { %734 = vperm.xlu1 %1723, %v614_v50  }
  0xee   : > { %v622_v55 = vpop.permute.xlu0 %621 }
  0xef   : > { %v626_v56 = vrot.slane %v622_v55, %v1994_v53 }
  0xf0   : > { %v629_v57 = vpop.permute.xlu1 %628 }
  0xf1   : > { %vm676_vm6 = vcmp.ge.s32.totalorder %v1996_v54, %v626_v56  ;;  %v633_v58 = vrot.slane %v629_v57, %v1994_v53 }
  0xf2   : > { %v686_v59 = vpop.permute.xlu0 %685 }
  0xf3   : > { %vm2002_vm7 = vcmp.ge.s32.totalorder %v1996_v54, %v633_v58  ;;  %v690_v61 = vrot.slane %v686_v59, %v1994_v53 }
  0xf4   : > { %v693_v62 = vpop.permute.xlu1 %692 }
  0xf5   : > { %vm740_vm8 = vcmp.lt.s32.totalorder %v1996_v54, %v690_v61  ;;  %v697_v63 = vrot.slane %v693_v62, %v1994_v53 }
  0xf6   : > { %vm748_vm9 = vmand %vm676_vm6, %vm740_vm8  ;;  %v636_v0 = vpop.permute.xlu0 %635 }
  0xf7   : > { %v1546_v1 = vsel %vm748_vm9, 1.0, %v1809_v31  ;;  %vm741_vm10 = vcmp.lt.s32.totalorder %v1996_v54, %v697_v63  ;;  %v640_v2 = vrot.slane %v636_v0, %v1994_v53 }
  0xf8   : > { %v772_v4 = vpack.c.bf16 %v1546_v1, %v1546_v1  ;;  %vm749_vm12 = vmand %vm2002_vm7, %vm741_vm10  ;;  %v700_v5 = vpop.permute.xlu1 %699 }
  0xf9   : > { %v1547_v6 = vsel %vm749_vm12, 1.0, %v1809_v31  ;;  %vm678_vm13 = vcmp.ge.s32.totalorder %v1996_v54, %v640_v2  ;;  %v704_v7 = vrot.slane %v700_v5, %v1994_v53 }
  0xfa   : > { %v773_v9 = vpack.c.bf16 %v1547_v6, %v1547_v6  ;;  %1602 = vmatmul.mubr.msk.bf16.vlgmr.msra.gmra.mxu0 %vm802_vm11, %v772_v4  ;;  %v643_v10 = vpop.permute.xlu0 %642 }
  0xfb   : > { %vm742_vm14 = vcmp.lt.s32.totalorder %v1996_v54, %v704_v7  ;;  %v647_v11 = vrot.slane %v643_v10, %v1994_v53  ;;  %1612 = vmatpush3.bf16.msra.mxu0 %v1726_v3  ;;  %1613 = vmatprep.mubr.msk.bf16.mxu0 %vm1810_vm5, %v1809_v31 }
  0xfc   : > { %vm750_vm15 = vmand %vm678_vm13, %vm742_vm14  ;;  %1608 = vmatmul.mubr.msk.bf16.vlgmr.msra.gmra.mxu1 %vm802_vm11, %v773_v9  ;;  %v707_v12 = vpop.permute.xlu1 %706  ;;  %1623 = vmatprep.subr.bf16.mxu0 %v1809_v31 }
  0xfd   : > { %v1548_v13 = vsel %vm750_vm15, 1.0, %v1809_v31  ;;  %vm679_vm0 = vcmp.ge.s32.totalorder %v1996_v54, %v647_v11  ;;  %1618 = vmatpush3.bf16.msra.mxu1 %v1727_v8  ;;  %v711_v14 = vrot.slane %v707_v12, %v1994_v53  ;;  %1619 = vmatprep.mubr.msk.bf16.mxu1 %vm1810_vm5, %v1809_v31 }
  0xfe   : > { %v650_v15 = vpop.permute.xlu0 %649  ;;  %1629 = vmatprep.subr.bf16.mxu1 %v1809_v31  ;;  %v774_v18 = vpack.c.bf16 %v1548_v13, %v1548_v13 }
  0xff   : > { %vm743_vm1 = vcmp.lt.s32.totalorder %v1996_v54, %v711_v14  ;;  %v654_v16 = vrot.slane %v650_v15, %v1994_v53 }
 0x100   : > { %vm751_vm2 = vmand %vm679_vm0, %vm743_vm1  ;;  %v714_v19 = vpop.permute.xlu1 %713  ;;  %vm1202_vm1 = vcmask 1042434  }
 0x101   : > { %v1549_v20 = vsel %vm751_vm2, 1.0, %v1809_v31  ;;  %vm680_vm3 = vcmp.ge.s32.totalorder %v1996_v54, %v654_v16  ;;  %v718_v21 = vrot.slane %v714_v19, %v1994_v53  ;;  %vm1208_vm2 = vcmask 1044484  }
 0x102   : > { %v775_v23 = vpack.c.bf16 %v1549_v20, %v1549_v20  ;;  %1614 = vmatmul.mubr.msk.bf16.vlgmr.msra.gmra.mxu0 %vm802_vm11, %v774_v18  ;;  %v657_v24 = vpop.permute.xlu0 %656 }
 0x103   : > { %vm744_vm4 = vcmp.lt.s32.totalorder %v1996_v54, %v718_v21  ;;  %v661_v25 = vrot.slane %v657_v24, %v1994_v53  ;;  %1624 = vmatpush3.bf16.msra.mxu0 %v1728_v17  ;;  %1625 = vmatprep.mubr.msk.bf16.mxu0 %vm1810_vm5, %v1809_v31  ;;  %v1189_v21 = vld [vmem:[#allocation2] sm:$0xff] }
 0x104   : > { %vm752_vm6 = vmand %vm680_vm3, %vm744_vm4  ;;  %v721_v26 = vpop.permute.xlu1 %720  ;;  %1620 = vmatmul.mubr.msk.bf16.vlgmr.msra.gmra.mxu1 %vm802_vm11, %v775_v23  ;;  %1635 = vmatprep.subr.bf16.mxu0 %v1809_v31  ;;  %vm1211_vm3 = vcmask 1045509   ;;  %vm1214_vm4 = vcmask 1046534  }
 0x105   : > { %v1550_v27 = vsel %vm752_vm6, 1.0, %v1809_v31  ;;  %vm681_vm7 = vcmp.ge.s32.totalorder %v1996_v54, %v661_v25  ;;  %v725_v28 = vrot.slane %v721_v26, %v1994_v53  ;;  %1630 = vmatpush3.bf16.msra.mxu1 %v1729_v22  ;;  %1631 = vmatprep.mubr.msk.bf16.mxu1 %vm1810_vm5, %v1809_v31  ;;  %vm1217_vm6 = vcmask 1047559  }
 0x106   : > { %v664_v29 = vpop.permute.xlu0 %663  ;;  %1641 = vmatprep.subr.bf16.mxu1 %v1809_v31  ;;  %v776_v33 = vpack.c.bf16 %v1550_v27, %v1550_v27 }
 0x107   : > { %vm745_vm8 = vcmp.lt.s32.totalorder %v1996_v54, %v725_v28  ;;  %v668_v30 = vrot.slane %v664_v29, %v1994_v53 }
 0x108   : > { %vm753_vm9 = vmand %vm681_vm7, %vm745_vm8  ;;  %v728_v34 = vpop.permute.xlu1 %727  ;;  %vm1221_vm7 = vcmask 261120  }
 0x109   : > { %v1551_v35 = vsel %vm753_vm9, 1.0, %v1809_v31  ;;  %vm682_vm10 = vcmp.ge.s32.totalorder %v1996_v54, %v668_v30  ;;  %v732_v36 = vrot.slane %v728_v34, %v1994_v53 }
 0x10a   : > { %v777_v38 = vpack.c.bf16 %v1551_v35, %v1551_v35  ;;  %1626 = vmatmul.mubr.msk.bf16.vlgmr.msra.gmra.mxu0 %vm802_vm11, %v776_v33  ;;  %v671_v39 = vpop.permute.xlu0 %670 }
 0x10b   : > { %vm746_vm12 = vcmp.lt.s32.totalorder %v1996_v54, %v732_v36  ;;  %v675_v40 = vrot.slane %v671_v39, %v1994_v53  ;;  %1636 = vmatpush3.bf16.msra.mxu0 %v1730_v32  ;;  %1637 = vmatprep.mubr.msk.bf16.mxu0 %vm1810_vm5, %v1809_v31 }
 0x10c   : > { %vm754_vm13 = vmand %vm682_vm10, %vm746_vm12  ;;  %v735_v41 = vpop.permute.xlu1 %734  ;;  %1632 = vmatmul.mubr.msk.bf16.vlgmr.msra.gmra.mxu1 %vm802_vm11, %v777_v38 }
 0x10d   : > { %v1552_v42 = vsel %vm754_vm13, 1.0, %v1809_v31  ;;  %vm683_vm14 = vcmp.ge.s32.totalorder %v1996_v54, %v675_v40  ;;  %v739_v43 = vrot.slane %v735_v41, %v1994_v53  ;;  %1642 = vmatpush3.bf16.msra.mxu1 %v1731_v37  ;;  %1643 = vmatprep.mubr.msk.bf16.mxu1 %vm1810_vm5, %v1809_v31  ;;  %vm1199_vm5 = vcmask 1041409  }
 0x10e   : > { %v778_v44 = vpack.c.bf16 %v1552_v42, %v1552_v42 }
 0x10f   : > { %vm747_vm15 = vcmp.lt.s32.totalorder %v1996_v54, %v739_v43 }
 0x110   : > { %vm755_vm0 = vmand %vm683_vm14, %vm747_vm15 }
 0x111   : > { %v1553_v45 = vsel %vm755_vm0, 1.0, %v1809_v31 }
 0x112   : > { %v779_v46 = vpack.c.bf16 %v1553_v45, %v1553_v45  ;;  %1638 = vmatmul.mubr.msk.bf16.vlgmr.msra.gmra.mxu0 %vm802_vm11, %v778_v44 }
 0x114   : > { %1644 = vmatmul.mubr.msk.bf16.vlgmr.msra.gmra.mxu1 %vm802_vm11, %v779_v46  ;;  %vm1205_vm11 = vcmask 1043459  }
 0x1ba   : > { %v840_v47 = vpop.f32.mrf.mxu0 }
 0x1bc   : > { %v1603_v48 = vpop.f32.mrf.mxu0  ;;  %v889_v49 = vpop.f32.mrf.mxu1 }
 0x1bd   : > { %v1198_v60 = vrot.slane %v889_v49, 7 }
 0x1be   : > { %v843_v50 = vpop.f32.mrf.mxu0  ;;  %v1609_v51 = vpop.f32.mrf.mxu1 }
 0x1bf   : > { %v1200_v1 = vsel %vm1199_vm5, %v1198_v60, %v840_v47 }
 0x1c0   : > { %v1604_v52 = vpop.f32.mrf.mxu0  ;;  %v892_v53 = vpop.f32.mrf.mxu1 }
 0x1c2   : > { %v1610_v55 = vpop.f32.mrf.mxu1  ;;  %v938_v56 = vpop.f32.mrf.mxu0 }
 0x1c3   : > { %v1201_v62 = vrot.slane %v938_v56, 6 }
 0x1c4   : > { %v1615_v57 = vpop.f32.mrf.mxu0  ;;  %v987_v54 = vpop.f32.mrf.mxu1 }
 0x1c5   : > { %v1204_v2 = vrot.slane %v987_v54, 5  ;;  %v1203_v5 = vsel %vm1202_vm1, %v1201_v62, %v1200_v1 }
 0x1c6   : > { %v941_v58 = vpop.f32.mrf.mxu0  ;;  %v1621_v59 = vpop.f32.mrf.mxu1 }
 0x1c7   : > { %v1206_v9 = vsel %vm1205_vm11, %v1204_v2, %v1203_v5 }
 0x1c8   : > { %v1616_v31 = vpop.f32.mrf.mxu0  ;;  %v990_v61 = vpop.f32.mrf.mxu1 }
 0x1ca   : > { %v1622_v63 = vpop.f32.mrf.mxu1  ;;  %v1036_v0 = vpop.f32.mrf.mxu0 }
 0x1cb   : > { %v1207_v6 = vrot.slane %v1036_v0, 4 }
 0x1cc   : > { %v1627_v3 = vpop.f32.mrf.mxu0  ;;  %v1085_v4 = vpop.f32.mrf.mxu1 }
 0x1cd   : > { %v1210_v10 = vrot.slane %v1085_v4, 3  ;;  %v1209_v13 = vsel %vm1208_vm2, %v1207_v6, %v1206_v9 }
 0x1ce   : > { %v1039_v7 = vpop.f32.mrf.mxu0  ;;  %v1633_v8 = vpop.f32.mrf.mxu1 }
 0x1cf   : > { %v1212_v17 = vsel %vm1211_vm3, %v1210_v10, %v1209_v13 }
 0x1d0   : > { %v1628_v11 = vpop.f32.mrf.mxu0  ;;  %v1088_v12 = vpop.f32.mrf.mxu1 }
 0x1d2   : > { %v1634_v14 = vpop.f32.mrf.mxu1  ;;  %v1134_v15 = vpop.f32.mrf.mxu0 }
 0x1d3   : > { %v1213_v16 = vrot.slane %v1134_v15, 2 }
 0x1d4   : > { %v1639_v18 = vpop.f32.mrf.mxu0  ;;  %v1183_v19 = vpop.f32.mrf.mxu1 }
 0x1d5   : > { %v1215_v20 = vsel %vm1214_vm4, %v1213_v16, %v1212_v17  ;;  %v1216_v22 = vrot.slane %v1183_v19, 1 }
 0x1d6   : > { %v1137_v23 = vpop.f32.mrf.mxu0  ;;  %v1645_v24 = vpop.f32.mrf.mxu1 }
 0x1d7   : > { %v1218_v25 = vsel %vm1217_vm6, %v1216_v22, %v1215_v20 }
 0x1d8   : > { %v1220_v26 = vadd.f32 %v1218_v25, %v1189_v21  ;;  %v1640_v27 = vpop.f32.mrf.mxu0  ;;  %v1186_v28 = vpop.f32.mrf.mxu1 }
 0x1da   : > { %1222 = vst.msk [vmem:[#allocation2] sm:$0xff] %vm1221_vm7, %v1220_v26  ;;  %v1646_v29 = vpop.f32.mrf.mxu1 }
 0x1db PF: > { %p1570_p12 = scmp.ne.s32.totalorder %s1787_s12, 3 }
 0x1dd   : > { %1226 = sbr.rel (%p1570_p12) target bundleno = 832 (0x340), region = 101 }
 0x1e2   : > { %v1227_v30 = vld [vmem:[%s1953_s24] sm:$0xff]  ;;  %v1811_v34 = vmov 0   ;;  %v1812_v35 = vmov 0.0   ;;  %vm1253_vm10 = vcmask 261120   ;;  %vm1813_vm14 = vmmov 0  }
 0x1e3   : > { %v1232_v32 = vld [vmem:[%s1959_s27] sm:$0xff]  ;;  %1732 = vset.pattern.permute.xlu0 %v1811_v34  ;;  %vm1228_vm8 = vcmp.gt.s32.totalorder %v1227_v30, 0  ;;  %1652 = vmatprep.subr.mxu1 %v1812_v35  ;;  %vm1414_vm0 = vcmask 23552  }
 0x1e4   : > { %v1251_v33 = vld [vmem:[%s2126_s5] sm:$0x7]  ;;  %vm1233_vm9 = vcmp.gt.s32.totalorder %v1232_v32, 0  ;;  %v1229_v37 = vsel %vm1228_vm8, %v1227_v30, 0  ;;  %1647 = vmatprep.subr.mxu0 %v1812_v35  ;;  %1654 = vmatprep.mubr.msk.f32.mxu1 %vm1813_vm14, %v1812_v35 }
 0x1e5   : > { %v1252_v36 = vld [vmem:[%s2127_s6] sm:$0x7]  ;;  %v1234_v38 = vsel %vm1233_vm9, %v1232_v32, 0  ;;  %1653 = vmatpush3.xpose.msk.msra.mxu1 %vm1253_vm10, %v1251_v33  ;;  %vm1230_vm12 = vcmp.lt.s32.totalorder %v1229_v37, 64  ;;  %1649 = vmatprep.mubr.msk.f32.mxu0 %vm1813_vm14, %v1812_v35 }
 0x1e6   : > { %vm1235_vm13 = vcmp.lt.s32.totalorder %v1234_v38, 64  ;;  %1648 = vmatpush3.xpose.msk.msra.mxu0 %vm1253_vm10, %v1252_v36  ;;  %v1231_v39 = vsel %vm1230_vm12, %v1229_v37, 64  ;;  %v1250_v44 = vld [vmem:[%s485_s28] sm:$0xff] }
 0x1e7   : > { %v1236_v40 = vsel %vm1235_vm13, %v1234_v38, 64  ;;  %v1243_v46 = vld [vmem:[#allocation2] sm:$0xff] }
 0x1e8   : > { %v1237_v41 = vsub.s32 %v1236_v40, %v1231_v39  ;;  %1655 = vmatmul.mubr.msk.f32.vlgmr.msra.gmra.mxu1 %vm1253_vm10, %v1250_v44  ;;  %v1575_v52 = vld [vmem:[%s2128_s7] ss:$0 sm:$0xff] }
 0x1ea   : > { %vm1238_vm15 = vcmp.gt.s32.totalorder %v1237_v41, 1 }
 0x1eb   : > { %v1239_v42 = vsel %vm1238_vm15, %v1237_v41, 1 }
 0x1ec   : > { %v1240_v43 = vcvt.s32.f32 %v1239_v42 }
 0x1ee   : > { %1733 = vrcp.f32 %v1240_v43 }
 0x1fb   : > { %v1734_v45 = vpop.eup %1733 }
 0x1fc   : > { %1246 = vperm.xlu0 %1732, %v1734_v45  }
 0x277   : > { %v1247_v47 = vpop.permute.xlu0 %1246 }
 0x278   : > { %v1249_v48 = vmul.f32 %v1247_v47, %v1243_v46 }
 0x27a   : > { %1650 = vmatmul.mubr.msk.f32.vlgmr.msra.gmra.mxu0 %vm1253_vm10, %v1249_v48 }
 0x2a8   : > { %v1402_v49 = vpop.f32.mrf.mxu1 }
 0x2aa   : > { %v1656_v50 = vpop.f32.mrf.mxu1 }
 0x33a   : > { %v1326_v51 = vpop.f32.mrf.mxu0 }
 0x33b   : > { %v1403_v53 = vadd.f32 %v1402_v49, %v1326_v51 }
 0x33c   : > { %v1651_v55 = vpop.f32.mrf.mxu0 }
 0x33d   : > { %v1413_v56 = vadd.f32 %v1575_v52, %v1403_v53 }
 0x33f   : > { %1415 = vst.msk [vmem:[%s489_s18] sm:$0xff] %vm1414_vm0, %v1413_v56 }
 0x340 PF: > { %s24_s15 = sadd.s32 1, %s1803_s15   ;;  %s2135_s23 = sld [smem:[#allocation7_spill]] }
 0x341   : > { %p21_p13 = scmp.ge.s32.totalorder %s24_s15, 10   ;;  %s2136_s10 = smov %s1783_s11 }
 0x342   : > { %s2137_s11 = smov %s1927_s9  ;;  %s2138_s12 = smov %s1795_s13 }
 0x343   : > { %s2139_s0 = smov %s1799_s14  ;;  %s2140_s13 = smov %s2147_s16 }
 0x344   :  { %23 = sbr.rel (!%p21_p13) target bundleno = 19 (0x13), region = 145 }
 0x346   : > { %s2141_s14 = smov %s2135_s23 }

</bundles_post_ra>
